<compile_context>
chip_gen: v7x
topology: tpu7x:2x2x1
jax: 0.10.0
libtpu: 0.0.40
codegen_flags: <defaults>
</compile_context>

<pallas_src>
import functools

import jax
import jax.numpy as jnp
import numpy as np
from jax.experimental import pallas as pl
from jax.experimental.pallas import tpu as pltpu

MM_DTYPE = jnp.bfloat16   # MXU operand dtype (f32 accumulation). jnp.float32 to disable.
EPS = 1e-5                # nn.InstanceNorm3d default
NEG_SLOPE = 0.01          # nn.LeakyReLU default


def _round_up(x, m):
    return (x + m - 1) // m * m


# ------------------------- fused Pallas kernel -------------------------

def _fused_stage_kernel(xcol_ref, wT_ref, b_ref, g_ref, be_ref, o_ref,
                        y_sc, sum_sc, ssq_sc, *, nt, tile, dhw, dhw_p):
    """One (sample, spatial-tile) grid step of the fused
    Conv3d(+bias) -> InstanceNorm3d(affine) -> LeakyReLU stage.

    - Conv3d is a single MXU matmul per tile: (Co, Kp) @ (Kp, tile), Kp = 27*Ci
      padded, spatial tile lane-dense (multiple of 128).
    - Conv output stays resident in a per-sample f32 VMEM scratch (no HBM
      round trip); per-channel sum / sum-of-squares accumulate across tiles.
    - At the last tile the per-channel scale/shift is computed once (EUP rsqrt)
      and the normalized + LeakyReLU result is written to the revisited output
      block in a single lane-dense pass.
    """
    t = pl.program_id(1)

    @pl.when(t == 0)
    def _init():
        sum_sc[...] = jnp.zeros_like(sum_sc)
        ssq_sc[...] = jnp.zeros_like(ssq_sc)

    # Conv-as-one-matmul for this spatial tile (f32 accumulation) + bias.
    y = jnp.dot(wT_ref[...], xcol_ref[0],
                preferred_element_type=jnp.float32) + b_ref[...]
    y_sc[t] = y

    if dhw_p != dhw:
        # Spatial extent was padded up to a multiple of 128: mask padded
        # columns out of the InstanceNorm statistics (static branch).
        lane = jax.lax.broadcasted_iota(jnp.int32, y.shape, 1) + t * tile
        y_stats = jnp.where(lane < dhw, y, 0.0)
    else:
        y_stats = y
    sum_sc[...] += jnp.sum(y_stats, axis=-1, keepdims=True)
    ssq_sc[...] += jnp.sum(y_stats * y_stats, axis=-1, keepdims=True)

    @pl.when(t == nt - 1)
    def _finalize():
        inv_count = 1.0 / dhw
        mean = sum_sc[...] * inv_count
        # E[x^2] - E[x]^2 can go slightly negative in f32 -> clamp.
        var = jnp.maximum(ssq_sc[...] * inv_count - mean * mean, 0.0)
        scale = g_ref[...] * jax.lax.rsqrt(var + EPS)   # EUP rsqrt
        shift = be_ref[...] - mean * scale
        for j in range(nt):   # static unroll; nt is small when tiles are large
            o = y_sc[j] * scale + shift
            o_ref[0, :, j * tile:(j + 1) * tile] = jnp.where(
                o >= 0.0, o, NEG_SLOPE * o).astype(o_ref.dtype)


# ------------------------- wrappers -------------------------

def _pick_tile(dhw_p, kp, co):
    """Largest lane-dense spatial tile whose buffers stay well inside the most
    restrictive VMEM budget (v7x: 32 MiB default scoped / 64 MiB physical)."""
    budget = 24 * 1024 * 1024
    fixed = co * dhw_p * 4            # whole-sample f32 conv-output scratch
    fixed += 2 * co * dhw_p * 4       # resident output block (<= f32), dbl-buffered
    fixed += 2 * co * kp * 2 + 6 * co * 4   # weights + per-channel params
    for t in (4096, 2048, 1024, 512, 256, 128):
        if dhw_p % t == 0 and fixed + 2 * kp * t * 2 <= budget:
            return t
    # TODO(synk): production widths where even tile=128 busts the budget need a
    # non-whole-sample-resident (streaming stats) variant.
    return 128


def _im2col3_ncdhw(x, stride):
    # x: (N, C, D, H, W) -> (N, 27*C, Do*Ho*Wo); row index = ((kd*3+kh)*3+kw)*C + c.
    # TODO(synk): replace with in-kernel halo DMA + tap slicing at large sizes.
    n, c, d, h, w = x.shape
    do = (d - 1) // stride + 1
    ho = (h - 1) // stride + 1
    wo = (w - 1) // stride + 1
    xp = jnp.pad(x, ((0, 0), (0, 0), (1, 1), (1, 1), (1, 1)))
    cols = []
    for kd in range(3):
        for kh in range(3):
            for kw in range(3):
                sl = xp[:, :,
                        kd:kd + stride * (do - 1) + 1:stride,
                        kh:kh + stride * (ho - 1) + 1:stride,
                        kw:kw + stride * (wo - 1) + 1:stride]
                cols.append(sl.reshape(n, c, do * ho * wo))
    xcol = jnp.stack(cols, axis=1).reshape(n, 27 * c, do * ho * wo)
    return xcol, (do, ho, wo)


def _conv_in_lrelu_stage(x, w, b, gamma, beta, stride, out_dtype):
    # x: (N, Ci, D, H, W) in MM_DTYPE; w: (Co, Ci, 3, 3, 3) (PyTorch layout).
    n = x.shape[0]
    co, ci = w.shape[0], w.shape[1]
    xcol, (do, ho, wo) = _im2col3_ncdhw(x, stride)
    k = 27 * ci
    dhw = do * ho * wo
    kp = _round_up(k, 32)          # bf16 sublane packing of the contraction dim
    dhw_p = _round_up(dhw, 128)    # lane-dense tiles -> unmasked stores
    xcol = jnp.pad(xcol, ((0, 0), (0, kp - k), (0, dhw_p - dhw)))
    tile = _pick_tile(dhw_p, kp, co)
    nt = dhw_p // tile

    # weight -> (Co, 27*Ci), column index ((kd*3+kh)*3+kw)*Ci + ci (matches im2col)
    wT = jnp.transpose(w, (0, 2, 3, 4, 1)).reshape(co, k)
    wT = jnp.pad(wT, ((0, 0), (0, kp - k))).astype(MM_DTYPE)

    kern = functools.partial(_fused_stage_kernel,
                             nt=nt, tile=tile, dhw=dhw, dhw_p=dhw_p)
    out = pl.pallas_call(
        kern,
        out_shape=jax.ShapeDtypeStruct((n, co, dhw_p), out_dtype),
        grid=(n, nt),
        in_specs=[pl.BlockSpec((1, kp, tile), lambda i, t: (i, 0, t)),
                  pl.BlockSpec((co, kp), lambda i, t: (0, 0)),
                  pl.BlockSpec((co, 1), lambda i, t: (0, 0)),
                  pl.BlockSpec((co, 1), lambda i, t: (0, 0)),
                  pl.BlockSpec((co, 1), lambda i, t: (0, 0))],
        out_specs=pl.BlockSpec((1, co, dhw_p), lambda i, t: (i, 0, 0)),
        scratch_shapes=[pltpu.VMEM((nt, co, tile), jnp.float32),  # resident conv out
                        pltpu.VMEM((co, 1), jnp.float32),         # sum
                        pltpu.VMEM((co, 1), jnp.float32)],        # sum of squares
        compiler_params=pltpu.CompilerParams(
            dimension_semantics=("parallel", "arbitrary")),
    )(xcol, wT,
      b.reshape(co, 1).astype(jnp.float32),
      gamma.reshape(co, 1).astype(jnp.float32),
      beta.reshape(co, 1).astype(jnp.float32))
    return out[:, :, :dhw].reshape(n, co, do, ho, wo)


def double_conv_forward(x, params, stride):
    # Cast *before* im2col so the 27x-expanded buffer is bf16; stage-1
    # activations stay bf16 (only consumed by the next matmul); final f32.
    x = x.astype(MM_DTYPE)
    h1 = _conv_in_lrelu_stage(x, params["w1"], params["b1"], params["g1"],
                              params["be1"], stride, MM_DTYPE)
    h2 = _conv_in_lrelu_stage(h1, params["w2"], params["b2"], params["g2"],
                              params["be2"], 1, jnp.float32)
    return h2


# ------------------------- pure-JAX reference -------------------------

def _conv_ref(x, w, b, stride, operand_dtype):
    y = jax.lax.conv_general_dilated(
        x.astype(operand_dtype), w.astype(operand_dtype),
        window_strides=(stride,) * 3, padding=((1, 1),) * 3,
        dimension_numbers=("NCDHW", "OIDHW", "NCDHW"),
        preferred_element_type=jnp.float32)
    return y + b.reshape(1, -1, 1, 1, 1).astype(jnp.float32)


def _in_lrelu_ref(y, g, be):
    mean = jnp.mean(y, axis=(2, 3, 4), keepdims=True)
    var = jnp.mean(jnp.square(y - mean), axis=(2, 3, 4), keepdims=True)
    yh = (y - mean) * jax.lax.rsqrt(var + EPS)
    yh = yh * g.reshape(1, -1, 1, 1, 1) + be.reshape(1, -1, 1, 1, 1)
    return jnp.where(yh >= 0.0, yh, NEG_SLOPE * yh)


def double_conv_ref(x, params, stride, operand_dtype=MM_DTYPE):
    # Same math as the PyTorch module, with conv operands rounded to the same
    # MXU operand dtype as the kernel (f32 accumulation / f32 norm math).
    h1 = _in_lrelu_ref(_conv_ref(x, params["w1"], params["b1"], stride, operand_dtype),
                       params["g1"], params["be1"])
    h2 = _in_lrelu_ref(_conv_ref(h1, params["w2"], params["b2"], 1, operand_dtype),
                       params["g2"], params["be2"])
    return h2


# ------------------------- main -------------------------

if __name__ == "__main__":
    # DoubleConv(in_channels=4, out_channels=8, stride=2)
    N, Cin, Cout, stride = 2, 4, 8, 2
    D = H = W = 16          # conv1 output: 8^3 = 512 voxels (lane-dense, 1 tile)

    key = jax.random.PRNGKey(0)
    ks = jax.random.split(key, 9)
    params = {
        "w1": 0.1 * jax.random.normal(ks[0], (Cout, Cin, 3, 3, 3), jnp.float32),
        "b1": 0.05 * jax.random.normal(ks[1], (Cout,), jnp.float32),
        "g1": 1.0 + 0.1 * jax.random.normal(ks[2], (Cout,), jnp.float32),
        "be1": 0.1 * jax.random.normal(ks[3], (Cout,), jnp.float32),
        "w2": 0.1 * jax.random.normal(ks[4], (Cout, Cout, 3, 3, 3), jnp.float32),
        "b2": 0.05 * jax.random.normal(ks[5], (Cout,), jnp.float32),
        "g2": 1.0 + 0.1 * jax.random.normal(ks[6], (Cout,), jnp.float32),
        "be2": 0.1 * jax.random.normal(ks[7], (Cout,), jnp.float32),
    }
    x = jax.random.normal(ks[8], (N, Cin, D, H, W), jnp.float32)   # NCDHW

    fwd = jax.jit(functools.partial(double_conv_forward, stride=stride))
    out = jax.block_until_ready(fwd(x, params))

    ref_fn = jax.jit(functools.partial(double_conv_ref, stride=stride))
    ref = jax.block_until_ready(ref_fn(x, params))

    Do = (D - 1) // stride + 1
    assert out.shape == (N, Cout, Do, Do, Do), out.shape
    # Tolerance covers f32 accumulation-order differences plus the bf16
    # re-rounding of the stage-1 activations fed into conv2 (operands are
    # matched-precision in the reference; accumulation/norm math is f32).
    np.testing.assert_allclose(np.asarray(out), np.asarray(ref),
                               rtol=1e-2, atol=1e-2)
    print("KERNEL_OK")
</pallas_src>

<mosaic_0001>
module attributes {stable_mosaic.version = 11 : i64} {
  func.func @_fused_stage_kernel(%arg0: i32, %arg1: i32, %arg2: memref<1x128x512xbf16, #tpu.memory_space<vmem>>, %arg3: memref<8x128xbf16, #tpu.memory_space<vmem>>, %arg4: memref<8x1xf32, #tpu.memory_space<vmem>>, %arg5: memref<8x1xf32, #tpu.memory_space<vmem>>, %arg6: memref<8x1xf32, #tpu.memory_space<vmem>>, %arg7: memref<1x8x512xbf16, #tpu.memory_space<vmem>>, %arg8: memref<1x8x512xf32, #tpu.memory_space<vmem>>, %arg9: memref<8x1xf32, #tpu.memory_space<vmem>>, %arg10: memref<8x1xf32, #tpu.memory_space<vmem>>) attributes {dimension_semantics = [#tpu.dimension_semantics<parallel>, #tpu.dimension_semantics<arbitrary>], iteration_bounds = array<i64: 2, 1>, scalar_prefetch = 0 : i64, scratch_operands = 3 : i64, tpu.core_type = #tpu.core_type<tc>, window_params = [{transform_indices = @transform_0, window_bounds = array<i64: 1, 128, 512>}, {pipeline_mode = #tpu.pipeline_mode<synchronous>, transform_indices = @transform_1, window_bounds = array<i64: 8, 128>}, {pipeline_mode = #tpu.pipeline_mode<synchronous>, transform_indices = @transform_2, window_bounds = array<i64: 8, 1>}, {pipeline_mode = #tpu.pipeline_mode<synchronous>, transform_indices = @transform_3, window_bounds = array<i64: 8, 1>}, {pipeline_mode = #tpu.pipeline_mode<synchronous>, transform_indices = @transform_4, window_bounds = array<i64: 8, 1>}, {transform_indices = @transform_5, window_bounds = array<i64: 1, 8, 512>}]} {
    %c0_i32 = arith.constant 0 : i32
    %0 = arith.cmpi eq, %arg1, %c0_i32 : i32
    %1 = arith.extui %0 : i1 to i32
    %c0_i32_0 = arith.constant 0 : i32
    %2 = arith.cmpi ne, %1, %c0_i32_0 : i32
    scf.if %2 {
      %cst_21 = arith.constant 0.000000e+00 : f32
      %28 = vector.broadcast %cst_21 : f32 to vector<8x1xf32>
      %c0_22 = arith.constant 0 : index
      %c0_23 = arith.constant 0 : index
      %29 = vector.load %arg9[%c0_22, %c0_23] : memref<8x1xf32, #tpu.memory_space<vmem>>, vector<8x1xf32>
      tpu.vector_store %arg9[%c0_22, %c0_23], %28 {strides = array<i32>} : memref<8x1xf32, #tpu.memory_space<vmem>>, vector<8x1xf32>,
      %cst_24 = arith.constant 0.000000e+00 : f32
      %30 = vector.broadcast %cst_24 : f32 to vector<8x1xf32>
      %c0_25 = arith.constant 0 : index
      %c0_26 = arith.constant 0 : index
      %31 = vector.load %arg10[%c0_25, %c0_26] : memref<8x1xf32, #tpu.memory_space<vmem>>, vector<8x1xf32>
      tpu.vector_store %arg10[%c0_25, %c0_26], %30 {strides = array<i32>} : memref<8x1xf32, #tpu.memory_space<vmem>>, vector<8x1xf32>,
    } else {
    }
    %c0 = arith.constant 0 : index
    %c0_1 = arith.constant 0 : index
    %3 = vector.load %arg3[%c0, %c0_1] : memref<8x128xbf16, #tpu.memory_space<vmem>>, vector<8x128xbf16>
    %c0_2 = arith.constant 0 : index
    %c0_3 = arith.constant 0 : index
    %c0_4 = arith.constant 0 : index
    %4 = vector.load %arg2[%c0_2, %c0_3, %c0_4] : memref<1x128x512xbf16, #tpu.memory_space<vmem>>, vector<1x128x512xbf16>
    %5 = vector.shape_cast %4 : vector<1x128x512xbf16> to vector<128x512xbf16>
    %cst = arith.constant dense<0.000000e+00> : vector<8x512xf32>
    %6 = tpu.matmul %3, %5, %cst {dimension_numbers = #tpu.dot_dimension_numbers<[1], [0], [0], [1], [0, 0, 1, 1], [], []>} : vector<8x128xbf16>, vector<128x512xbf16>, vector<8x512xf32> -> vector<8x512xf32>
    %c0_5 = arith.constant 0 : index
    %c0_6 = arith.constant 0 : index
    %7 = vector.load %arg4[%c0_5, %c0_6] : memref<8x1xf32, #tpu.memory_space<vmem>>, vector<8x1xf32>
    %8 = vector.broadcast %7 : vector<8x1xf32> to vector<8x512xf32>
    %9 = arith.addf %6, %8 : vector<8x512xf32>
    %10 = arith.index_cast %arg1 : i32 to index
    %c0_7 = arith.constant 0 : index
    %c0_8 = arith.constant 0 : index
    %11 = vector.load %arg8[%10, %c0_7, %c0_8] : memref<1x8x512xf32, #tpu.memory_space<vmem>>, vector<1x8x512xf32>
    %12 = vector.shape_cast %11 : vector<1x8x512xf32> to vector<8x512xf32>
    %13 = vector.shape_cast %9 : vector<8x512xf32> to vector<1x8x512xf32>
    tpu.vector_store %arg8[%10, %c0_7, %c0_8], %13 {strides = array<i32>} : memref<1x8x512xf32, #tpu.memory_space<vmem>>, vector<1x8x512xf32>,
    %c0_9 = arith.constant 0 : index
    %c0_10 = arith.constant 0 : index
    %14 = vector.load %arg9[%c0_9, %c0_10] : memref<8x1xf32, #tpu.memory_space<vmem>>, vector<8x1xf32>
    %cst_11 = arith.constant dense<0.000000e+00> : vector<8xf32>
    %15 = vector.multi_reduction <add>, %9, %cst_11 [1] : vector<8x512xf32> to vector<8xf32>
    %16 = vector.shape_cast %15 : vector<8xf32> to vector<8x1xf32>
    %17 = arith.addf %14, %16 : vector<8x1xf32>
    %c0_12 = arith.constant 0 : index
    %c0_13 = arith.constant 0 : index
    %18 = vector.load %arg9[%c0_12, %c0_13] : memref<8x1xf32, #tpu.memory_space<vmem>>, vector<8x1xf32>
    tpu.vector_store %arg9[%c0_12, %c0_13], %17 {strides = array<i32>} : memref<8x1xf32, #tpu.memory_space<vmem>>, vector<8x1xf32>,
    %c0_14 = arith.constant 0 : index
    %c0_15 = arith.constant 0 : index
    %19 = vector.load %arg10[%c0_14, %c0_15] : memref<8x1xf32, #tpu.memory_space<vmem>>, vector<8x1xf32>
    %20 = arith.mulf %9, %9 : vector<8x512xf32>
    %cst_16 = arith.constant dense<0.000000e+00> : vector<8xf32>
    %21 = vector.multi_reduction <add>, %20, %cst_16 [1] : vector<8x512xf32> to vector<8xf32>
    %22 = vector.shape_cast %21 : vector<8xf32> to vector<8x1xf32>
    %23 = arith.addf %19, %22 : vector<8x1xf32>
    %c0_17 = arith.constant 0 : index
    %c0_18 = arith.constant 0 : index
    %24 = vector.load %arg10[%c0_17, %c0_18] : memref<8x1xf32, #tpu.memory_space<vmem>>, vector<8x1xf32>
    tpu.vector_store %arg10[%c0_17, %c0_18], %23 {strides = array<i32>} : memref<8x1xf32, #tpu.memory_space<vmem>>, vector<8x1xf32>,
    %c0_i32_19 = arith.constant 0 : i32
    %25 = arith.cmpi eq, %arg1, %c0_i32_19 : i32
    %26 = arith.extui %25 : i1 to i32
    %c0_i32_20 = arith.constant 0 : i32
    %27 = arith.cmpi ne, %26, %c0_i32_20 : i32
    scf.if %27 {
      %c0_21 = arith.constant 0 : index
      %c0_22 = arith.constant 0 : index
      %28 = vector.load %arg9[%c0_21, %c0_22] : memref<8x1xf32, #tpu.memory_space<vmem>>, vector<8x1xf32>
      %cst_23 = arith.constant 0.001953125 : f32
      %29 = vector.broadcast %cst_23 : f32 to vector<8x1xf32>
      %30 = arith.mulf %28, %29 : vector<8x1xf32>
      %c0_24 = arith.constant 0 : index
      %c0_25 = arith.constant 0 : index
      %31 = vector.load %arg10[%c0_24, %c0_25] : memref<8x1xf32, #tpu.memory_space<vmem>>, vector<8x1xf32>
      %cst_26 = arith.constant 0.001953125 : f32
      %32 = vector.broadcast %cst_26 : f32 to vector<8x1xf32>
      %33 = arith.mulf %31, %32 : vector<8x1xf32>
      %34 = arith.mulf %30, %30 : vector<8x1xf32>
      %35 = arith.subf %33, %34 : vector<8x1xf32>
      %cst_27 = arith.constant 0.000000e+00 : f32
      %36 = vector.broadcast %cst_27 : f32 to vector<8x1xf32>
      %37 = arith.maximumf %35, %36 : vector<8x1xf32>
      %c0_28 = arith.constant 0 : index
      %c0_29 = arith.constant 0 : index
      %38 = vector.load %arg5[%c0_28, %c0_29] : memref<8x1xf32, #tpu.memory_space<vmem>>, vector<8x1xf32>
      %cst_30 = arith.constant 9.99999974E-6 : f32
      %39 = vector.broadcast %cst_30 : f32 to vector<8x1xf32>
      %40 = arith.addf %37, %39 : vector<8x1xf32>
      %41 = math.rsqrt %40 : vector<8x1xf32>
      %42 = arith.mulf %38, %41 : vector<8x1xf32>
      %c0_31 = arith.constant 0 : index
      %c0_32 = arith.constant 0 : index
      %43 = vector.load %arg6[%c0_31, %c0_32] : memref<8x1xf32, #tpu.memory_space<vmem>>, vector<8x1xf32>
      %44 = arith.mulf %30, %42 : vector<8x1xf32>
      %45 = arith.subf %43, %44 : vector<8x1xf32>
      %c0_33 = arith.constant 0 : index
      %c0_34 = arith.constant 0 : index
      %c0_35 = arith.constant 0 : index
      %46 = vector.load %arg8[%c0_33, %c0_34, %c0_35] : memref<1x8x512xf32, #tpu.memory_space<vmem>>, vector<1x8x512xf32>
      %47 = vector.shape_cast %46 : vector<1x8x512xf32> to vector<8x512xf32>
      %48 = vector.broadcast %42 : vector<8x1xf32> to vector<8x512xf32>
      %49 = arith.mulf %47, %48 : vector<8x512xf32>
      %50 = vector.broadcast %45 : vector<8x1xf32> to vector<8x512xf32>
      %51 = arith.addf %49, %50 : vector<8x512xf32>
      %cst_36 = arith.constant 0.000000e+00 : f32
      %52 = vector.broadcast %cst_36 : f32 to vector<8x512xf32>
      %53 = arith.cmpf oge, %51, %52 : vector<8x512xf32>
      %cst_37 = arith.constant 0.00999999977 : f32
      %54 = vector.broadcast %cst_37 : f32 to vector<8x512xf32>
      %55 = arith.mulf %54, %51 : vector<8x512xf32>
      %56 = arith.select %53, %51, %55 : vector<8x512xi1>, vector<8x512xf32>
      %57 = arith.truncf %56 : vector<8x512xf32> to vector<8x512xbf16>
      %c0_38 = arith.constant 0 : index
      %c0_39 = arith.constant 0 : index
      %c0_40 = arith.constant 0 : index
      %58 = vector.load %arg7[%c0_38, %c0_39, %c0_40] : memref<1x8x512xbf16, #tpu.memory_space<vmem>>, vector<1x8x512xbf16>
      %59 = vector.shape_cast %58 : vector<1x8x512xbf16> to vector<8x512xbf16>
      %60 = vector.shape_cast %57 : vector<8x512xbf16> to vector<1x8x512xbf16>
      tpu.vector_store %arg7[%c0_38, %c0_39, %c0_40], %60 {strides = array<i32>} : memref<1x8x512xbf16, #tpu.memory_space<vmem>>, vector<1x8x512xbf16>,
    } else {
    }
    return
  }
  func.func @transform_0(%arg0: i32, %arg1: i32) -> (i32, i32, i32) {
    %c0_i32 = arith.constant 0 : i32
    %c0_i32_0 = arith.constant 0 : i32
    return %arg0, %c0_i32, %arg1 : i32, i32, i32
  }
  func.func @transform_1(%arg0: i32, %arg1: i32) -> (i32, i32) {
    %c0_i32 = arith.constant 0 : i32
    %c0_i32_0 = arith.constant 0 : i32
    %c0_i32_1 = arith.constant 0 : i32
    return %c0_i32, %c0_i32_0 : i32, i32
  }
  func.func @transform_2(%arg0: i32, %arg1: i32) -> (i32, i32) {
    %c0_i32 = arith.constant 0 : i32
    %c0_i32_0 = arith.constant 0 : i32
    %c0_i32_1 = arith.constant 0 : i32
    return %c0_i32, %c0_i32_0 : i32, i32
  }
  func.func @transform_3(%arg0: i32, %arg1: i32) -> (i32, i32) {
    %c0_i32 = arith.constant 0 : i32
    %c0_i32_0 = arith.constant 0 : i32
    %c0_i32_1 = arith.constant 0 : i32
    return %c0_i32, %c0_i32_0 : i32, i32
  }
  func.func @transform_4(%arg0: i32, %arg1: i32) -> (i32, i32) {
    %c0_i32 = arith.constant 0 : i32
    %c0_i32_0 = arith.constant 0 : i32
    %c0_i32_1 = arith.constant 0 : i32
    return %c0_i32, %c0_i32_0 : i32, i32
  }
  func.func @transform_5(%arg0: i32, %arg1: i32) -> (i32, i32, i32) {
    %c0_i32 = arith.constant 0 : i32
    %c0_i32_0 = arith.constant 0 : i32
    %c0_i32_1 = arith.constant 0 : i32
    return %arg0, %c0_i32, %c0_i32_0 : i32, i32, i32
  }
}

module attributes {stable_mosaic.version = 11 : i64} {
  func.func @_fused_stage_kernel(%arg0: i32, %arg1: i32, %arg2: memref<1x224x512xbf16, #tpu.memory_space<vmem>>, %arg3: memref<8x224xbf16, #tpu.memory_space<vmem>>, %arg4: memref<8x1xf32, #tpu.memory_space<vmem>>, %arg5: memref<8x1xf32, #tpu.memory_space<vmem>>, %arg6: memref<8x1xf32, #tpu.memory_space<vmem>>, %arg7: memref<1x8x512xf32, #tpu.memory_space<vmem>>, %arg8: memref<1x8x512xf32, #tpu.memory_space<vmem>>, %arg9: memref<8x1xf32, #tpu.memory_space<vmem>>, %arg10: memref<8x1xf32, #tpu.memory_space<vmem>>) attributes {dimension_semantics = [#tpu.dimension_semantics<parallel>, #tpu.dimension_semantics<arbitrary>], iteration_bounds = array<i64: 2, 1>, scalar_prefetch = 0 : i64, scratch_operands = 3 : i64, tpu.core_type = #tpu.core_type<tc>, window_params = [{transform_indices = @transform_0, window_bounds = array<i64: 1, 224, 512>}, {pipeline_mode = #tpu.pipeline_mode<synchronous>, transform_indices = @transform_1, window_bounds = array<i64: 8, 224>}, {pipeline_mode = #tpu.pipeline_mode<synchronous>, transform_indices = @transform_2, window_bounds = array<i64: 8, 1>}, {pipeline_mode = #tpu.pipeline_mode<synchronous>, transform_indices = @transform_3, window_bounds = array<i64: 8, 1>}, {pipeline_mode = #tpu.pipeline_mode<synchronous>, transform_indices = @transform_4, window_bounds = array<i64: 8, 1>}, {transform_indices = @transform_5, window_bounds = array<i64: 1, 8, 512>}]} {
    %c0_i32 = arith.constant 0 : i32
    %0 = arith.cmpi eq, %arg1, %c0_i32 : i32
    %1 = arith.extui %0 : i1 to i32
    %c0_i32_0 = arith.constant 0 : i32
    %2 = arith.cmpi ne, %1, %c0_i32_0 : i32
    scf.if %2 {
      %cst_21 = arith.constant 0.000000e+00 : f32
      %28 = vector.broadcast %cst_21 : f32 to vector<8x1xf32>
      %c0_22 = arith.constant 0 : index
      %c0_23 = arith.constant 0 : index
      %29 = vector.load %arg9[%c0_22, %c0_23] : memref<8x1xf32, #tpu.memory_space<vmem>>, vector<8x1xf32>
      tpu.vector_store %arg9[%c0_22, %c0_23], %28 {strides = array<i32>} : memref<8x1xf32, #tpu.memory_space<vmem>>, vector<8x1xf32>,
      %cst_24 = arith.constant 0.000000e+00 : f32
      %30 = vector.broadcast %cst_24 : f32 to vector<8x1xf32>
      %c0_25 = arith.constant 0 : index
      %c0_26 = arith.constant 0 : index
      %31 = vector.load %arg10[%c0_25, %c0_26] : memref<8x1xf32, #tpu.memory_space<vmem>>, vector<8x1xf32>
      tpu.vector_store %arg10[%c0_25, %c0_26], %30 {strides = array<i32>} : memref<8x1xf32, #tpu.memory_space<vmem>>, vector<8x1xf32>,
    } else {
    }
    %c0 = arith.constant 0 : index
    %c0_1 = arith.constant 0 : index
    %3 = vector.load %arg3[%c0, %c0_1] : memref<8x224xbf16, #tpu.memory_space<vmem>>, vector<8x224xbf16>
    %c0_2 = arith.constant 0 : index
    %c0_3 = arith.constant 0 : index
    %c0_4 = arith.constant 0 : index
    %4 = vector.load %arg2[%c0_2, %c0_3, %c0_4] : memref<1x224x512xbf16, #tpu.memory_space<vmem>>, vector<1x224x512xbf16>
    %5 = vector.shape_cast %4 : vector<1x224x512xbf16> to vector<224x512xbf16>
    %cst = arith.constant dense<0.000000e+00> : vector<8x512xf32>
    %6 = tpu.matmul %3, %5, %cst {dimension_numbers = #tpu.dot_dimension_numbers<[1], [0], [0], [1], [0, 0, 1, 1], [], []>} : vector<8x224xbf16>, vector<224x512xbf16>, vector<8x512xf32> -> vector<8x512xf32>
    %c0_5 = arith.constant 0 : index
    %c0_6 = arith.constant 0 : index
    %7 = vector.load %arg4[%c0_5, %c0_6] : memref<8x1xf32, #tpu.memory_space<vmem>>, vector<8x1xf32>
    %8 = vector.broadcast %7 : vector<8x1xf32> to vector<8x512xf32>
    %9 = arith.addf %6, %8 : vector<8x512xf32>
    %10 = arith.index_cast %arg1 : i32 to index
    %c0_7 = arith.constant 0 : index
    %c0_8 = arith.constant 0 : index
    %11 = vector.load %arg8[%10, %c0_7, %c0_8] : memref<1x8x512xf32, #tpu.memory_space<vmem>>, vector<1x8x512xf32>
    %12 = vector.shape_cast %11 : vector<1x8x512xf32> to vector<8x512xf32>
    %13 = vector.shape_cast %9 : vector<8x512xf32> to vector<1x8x512xf32>
    tpu.vector_store %arg8[%10, %c0_7, %c0_8], %13 {strides = array<i32>} : memref<1x8x512xf32, #tpu.memory_space<vmem>>, vector<1x8x512xf32>,
    %c0_9 = arith.constant 0 : index
    %c0_10 = arith.constant 0 : index
    %14 = vector.load %arg9[%c0_9, %c0_10] : memref<8x1xf32, #tpu.memory_space<vmem>>, vector<8x1xf32>
    %cst_11 = arith.constant dense<0.000000e+00> : vector<8xf32>
    %15 = vector.multi_reduction <add>, %9, %cst_11 [1] : vector<8x512xf32> to vector<8xf32>
    %16 = vector.shape_cast %15 : vector<8xf32> to vector<8x1xf32>
    %17 = arith.addf %14, %16 : vector<8x1xf32>
    %c0_12 = arith.constant 0 : index
    %c0_13 = arith.constant 0 : index
    %18 = vector.load %arg9[%c0_12, %c0_13] : memref<8x1xf32, #tpu.memory_space<vmem>>, vector<8x1xf32>
    tpu.vector_store %arg9[%c0_12, %c0_13], %17 {strides = array<i32>} : memref<8x1xf32, #tpu.memory_space<vmem>>, vector<8x1xf32>,
    %c0_14 = arith.constant 0 : index
    %c0_15 = arith.constant 0 : index
    %19 = vector.load %arg10[%c0_14, %c0_15] : memref<8x1xf32, #tpu.memory_space<vmem>>, vector<8x1xf32>
    %20 = arith.mulf %9, %9 : vector<8x512xf32>
    %cst_16 = arith.constant dense<0.000000e+00> : vector<8xf32>
    %21 = vector.multi_reduction <add>, %20, %cst_16 [1] : vector<8x512xf32> to vector<8xf32>
    %22 = vector.shape_cast %21 : vector<8xf32> to vector<8x1xf32>
    %23 = arith.addf %19, %22 : vector<8x1xf32>
    %c0_17 = arith.constant 0 : index
    %c0_18 = arith.constant 0 : index
    %24 = vector.load %arg10[%c0_17, %c0_18] : memref<8x1xf32, #tpu.memory_space<vmem>>, vector<8x1xf32>
    tpu.vector_store %arg10[%c0_17, %c0_18], %23 {strides = array<i32>} : memref<8x1xf32, #tpu.memory_space<vmem>>, vector<8x1xf32>,
    %c0_i32_19 = arith.constant 0 : i32
    %25 = arith.cmpi eq, %arg1, %c0_i32_19 : i32
    %26 = arith.extui %25 : i1 to i32
    %c0_i32_20 = arith.constant 0 : i32
    %27 = arith.cmpi ne, %26, %c0_i32_20 : i32
    scf.if %27 {
      %c0_21 = arith.constant 0 : index
      %c0_22 = arith.constant 0 : index
      %28 = vector.load %arg9[%c0_21, %c0_22] : memref<8x1xf32, #tpu.memory_space<vmem>>, vector<8x1xf32>
      %cst_23 = arith.constant 0.001953125 : f32
      %29 = vector.broadcast %cst_23 : f32 to vector<8x1xf32>
      %30 = arith.mulf %28, %29 : vector<8x1xf32>
      %c0_24 = arith.constant 0 : index
      %c0_25 = arith.constant 0 : index
      %31 = vector.load %arg10[%c0_24, %c0_25] : memref<8x1xf32, #tpu.memory_space<vmem>>, vector<8x1xf32>
      %cst_26 = arith.constant 0.001953125 : f32
      %32 = vector.broadcast %cst_26 : f32 to vector<8x1xf32>
      %33 = arith.mulf %31, %32 : vector<8x1xf32>
      %34 = arith.mulf %30, %30 : vector<8x1xf32>
      %35 = arith.subf %33, %34 : vector<8x1xf32>
      %cst_27 = arith.constant 0.000000e+00 : f32
      %36 = vector.broadcast %cst_27 : f32 to vector<8x1xf32>
      %37 = arith.maximumf %35, %36 : vector<8x1xf32>
      %c0_28 = arith.constant 0 : index
      %c0_29 = arith.constant 0 : index
      %38 = vector.load %arg5[%c0_28, %c0_29] : memref<8x1xf32, #tpu.memory_space<vmem>>, vector<8x1xf32>
      %cst_30 = arith.constant 9.99999974E-6 : f32
      %39 = vector.broadcast %cst_30 : f32 to vector<8x1xf32>
      %40 = arith.addf %37, %39 : vector<8x1xf32>
      %41 = math.rsqrt %40 : vector<8x1xf32>
      %42 = arith.mulf %38, %41 : vector<8x1xf32>
      %c0_31 = arith.constant 0 : index
      %c0_32 = arith.constant 0 : index
      %43 = vector.load %arg6[%c0_31, %c0_32] : memref<8x1xf32, #tpu.memory_space<vmem>>, vector<8x1xf32>
      %44 = arith.mulf %30, %42 : vector<8x1xf32>
      %45 = arith.subf %43, %44 : vector<8x1xf32>
      %c0_33 = arith.constant 0 : index
      %c0_34 = arith.constant 0 : index
      %c0_35 = arith.constant 0 : index
      %46 = vector.load %arg8[%c0_33, %c0_34, %c0_35] : memref<1x8x512xf32, #tpu.memory_space<vmem>>, vector<1x8x512xf32>
      %47 = vector.shape_cast %46 : vector<1x8x512xf32> to vector<8x512xf32>
      %48 = vector.broadcast %42 : vector<8x1xf32> to vector<8x512xf32>
      %49 = arith.mulf %47, %48 : vector<8x512xf32>
      %50 = vector.broadcast %45 : vector<8x1xf32> to vector<8x512xf32>
      %51 = arith.addf %49, %50 : vector<8x512xf32>
      %cst_36 = arith.constant 0.000000e+00 : f32
      %52 = vector.broadcast %cst_36 : f32 to vector<8x512xf32>
      %53 = arith.cmpf oge, %51, %52 : vector<8x512xf32>
      %cst_37 = arith.constant 0.00999999977 : f32
      %54 = vector.broadcast %cst_37 : f32 to vector<8x512xf32>
      %55 = arith.mulf %54, %51 : vector<8x512xf32>
      %56 = arith.select %53, %51, %55 : vector<8x512xi1>, vector<8x512xf32>
      %c0_38 = arith.constant 0 : index
      %c0_39 = arith.constant 0 : index
      %c0_40 = arith.constant 0 : index
      %57 = vector.load %arg7[%c0_38, %c0_39, %c0_40] : memref<1x8x512xf32, #tpu.memory_space<vmem>>, vector<1x8x512xf32>
      %58 = vector.shape_cast %57 : vector<1x8x512xf32> to vector<8x512xf32>
      %59 = vector.shape_cast %56 : vector<8x512xf32> to vector<1x8x512xf32>
      tpu.vector_store %arg7[%c0_38, %c0_39, %c0_40], %59 {strides = array<i32>} : memref<1x8x512xf32, #tpu.memory_space<vmem>>, vector<1x8x512xf32>,
    } else {
    }
    return
  }
  func.func @transform_0(%arg0: i32, %arg1: i32) -> (i32, i32, i32) {
    %c0_i32 = arith.constant 0 : i32
    %c0_i32_0 = arith.constant 0 : i32
    return %arg0, %c0_i32, %arg1 : i32, i32, i32
  }
  func.func @transform_1(%arg0: i32, %arg1: i32) -> (i32, i32) {
    %c0_i32 = arith.constant 0 : i32
    %c0_i32_0 = arith.constant 0 : i32
    %c0_i32_1 = arith.constant 0 : i32
    return %c0_i32, %c0_i32_0 : i32, i32
  }
  func.func @transform_2(%arg0: i32, %arg1: i32) -> (i32, i32) {
    %c0_i32 = arith.constant 0 : i32
    %c0_i32_0 = arith.constant 0 : i32
    %c0_i32_1 = arith.constant 0 : i32
    return %c0_i32, %c0_i32_0 : i32, i32
  }
  func.func @transform_3(%arg0: i32, %arg1: i32) -> (i32, i32) {
    %c0_i32 = arith.constant 0 : i32
    %c0_i32_0 = arith.constant 0 : i32
    %c0_i32_1 = arith.constant 0 : i32
    return %c0_i32, %c0_i32_0 : i32, i32
  }
  func.func @transform_4(%arg0: i32, %arg1: i32) -> (i32, i32) {
    %c0_i32 = arith.constant 0 : i32
    %c0_i32_0 = arith.constant 0 : i32
    %c0_i32_1 = arith.constant 0 : i32
    return %c0_i32, %c0_i32_0 : i32, i32
  }
  func.func @transform_5(%arg0: i32, %arg1: i32) -> (i32, i32, i32) {
    %c0_i32 = arith.constant 0 : i32
    %c0_i32_0 = arith.constant 0 : i32
    %c0_i32_1 = arith.constant 0 : i32
    return %arg0, %c0_i32, %c0_i32_0 : i32, i32, i32
  }
}

</mosaic_0001>

<bundles_post_ra>
// kernel: double_conv_forward.2
= control target key start
LH: loop header
LB: loop body
LE: loop exit
PB: predicated region body
PF: predicated region fallthrough
CT: control target
= control target key end

     0   :  { %s893_s18 = smov 0   ;;  %s895_s19 = smov 0   ;;  %s980_s0 = inlined_call_operand.vmem [shape: bf16[2,128,512], index: 0, kind: input, shape index: {}]   ;;  %s981_s1 = inlined_call_operand.vmem [shape: bf16[8,128], index: 1, kind: input, shape index: {}]   ;;  %s982_s2 = inlined_call_operand.vmem [shape: f32[8,1], index: 2, kind: input, shape index: {}]   ;;  %s983_s3 = inlined_call_operand.vmem [shape: f32[8,1], index: 3, kind: input, shape index: {}]   ;;  %s984_s4 = inlined_call_operand.vmem [shape: f32[8,1], index: 4, kind: input, shape index: {}]   ;;  %s985_s5 = inlined_call_operand.vmem [shape: bf16[2,8,512], index: 5, kind: output, shape index: {}]  }
   0x1   :  { %s897_s20 = smov 0  }
   0x2 LB: > { %s27_s21 = sadd.s32 1, %s855_s19  ;;  %p714_p0 = scmp.ge.s32.totalorder %s859_s20, 1  ;;  %s859_s20 = sphi %s897_s20, %s15_s20   ;;  %s855_s19 = sphi %s895_s19, %s987_s19   ;;  %s851_s18 = sphi %s893_s18, %s986_s18  }
   0x3   : > { %p29_p1 = scmp.ge.s32.totalorder %s27_s21, 2  ;;  %p206_p2 = scmp.lt.s32.totalorder %s859_s20, 3 }
   0x5   : > { %s989_s21 = smov (%p29_p1, %s27_s21), 0  ;;  %p207_p3 = pnand %p714_p0, %p206_p2 }
   0x6   : > { %p239_p4 = scmp.lt.s32.totalorder (!%p207_p3), %s851_s18, 1  ;;  %v294_v0 = vld [vmem:[%s982_s2] sm:$0xff] (!%p207_p3)  ;;  %v861_v1 = vmov (!%p207_p3), 0   ;;  %vm258_vm0 = vcmask (!%p207_p3), 7168   ;;  %v862_v35 = vmov (!%p207_p3), 0.0  }
   0x7   : > { %210 = sbr.rel (%p207_p3) target bundleno = 588 (0x24c), region = 40  ;;  %492 = vmatprep.mubr.bf16.mxu0 (!%p207_p3), %v861_v1  ;;  %533 = vmatprep.mubr.bf16.mxu1 (!%p207_p3), %v861_v1  ;;  %v261_v34 = vld [vmem:[%s981_s1] sm:$0xf] (!%p207_p3)  ;;  %259 = vst.msk [vmem:[#allocation3] sm:$0xff] (!%p207_p3), %vm258_vm0, %v862_v35  ;;  %260 = vst.msk [vmem:[#allocation4] sm:$0xff] (!%p207_p3), %vm258_vm0, %v862_v35 }
   0x8   : > { %785 = vset.pattern.permute.xlu0 (!%p207_p3), %v861_v1  ;;  %786 = vset.pattern.permute.xlu1 (!%p207_p3), %v861_v1 }
   0x9   : > { %297 = vperm.xlu0 (!%p207_p3), %785, %v294_v0  }
   0xe   : > { %s991_s18 = smov (!%p239_p4, %s851_s18), 1  ;;  %v549_v59 = vld [vmem:[#allocation3] sm:$0xff]  ;;  %v558_v61 = vld [vmem:[#allocation4] sm:$0xff] }
   0xf   : > { %s755_s24 = sshll.u32 %s991_s18, 8  ;;  %s756_s9 = sshll.u32 %s991_s18, 4 }
  0x10   : > { %s920_s27 = scalar_lea.vmem %s980_s0, %s755_s24  ;;  %s252_s12 = scalar_lea.vmem %s985_s5, %s756_s9 }
  0x11   : > { %v787_v2 = vld [vmem:[%s920_s27 + $0x4] ss:$16 sps:$4 sm:$0xff]   ;;  %v789_v3 = vld [vmem:[%s920_s27 + $0xc] ss:$16 sps:$4 sm:$0xff]   ;;  %v791_v4 = vld [vmem:[%s920_s27] ss:$16 sps:$4 sm:$0xff]  }
  0x12   : > { %460 = vmatprep.subr.bf16.mxu0 %v787_v2  ;;  %v792_v5 = vld [vmem:[%s920_s27 + $0x8] ss:$16 sps:$4 sm:$0xff]   ;;  %501 = vmatprep.subr.bf16.mxu1 %v789_v3  ;;  %v793_v6 = vld [vmem:[%s920_s27 + $0x24] ss:$16 sps:$4 sm:$0xff]   ;;  %v795_v7 = vld [vmem:[%s920_s27 + $0x2c] ss:$16 sps:$4 sm:$0xff]  }
  0x13   : > { %461 = vmatpush1.bf16.msra.mxu0 %v791_v4  ;;  %502 = vmatpush1.bf16.msra.mxu1 %v792_v5  ;;  %v797_v8 = vld [vmem:[%s920_s27 + $0x20] ss:$16 sps:$4 sm:$0xff]   ;;  %v798_v9 = vld [vmem:[%s920_s27 + $0x28] ss:$16 sps:$4 sm:$0xff]   ;;  %v799_v10 = vld [vmem:[%s920_s27 + $0x44] ss:$16 sps:$4 sm:$0xff]  }
  0x14   : > { %462 = vmatprep.subr.bf16.mxu0 %v793_v6  ;;  %503 = vmatprep.subr.bf16.mxu1 %v795_v7  ;;  %v801_v11 = vld [vmem:[%s920_s27 + $0x4c] ss:$16 sps:$4 sm:$0xff]   ;;  %v803_v12 = vld [vmem:[%s920_s27 + $0x40] ss:$16 sps:$4 sm:$0xff]   ;;  %v804_v13 = vld [vmem:[%s920_s27 + $0x48] ss:$16 sps:$4 sm:$0xff]  }
  0x15   : > { %v805_v14 = vld [vmem:[%s920_s27 + $0x64] ss:$16 sps:$4 sm:$0xff]   ;;  %v807_v15 = vld [vmem:[%s920_s27 + $0x6c] ss:$16 sps:$4 sm:$0xff]   ;;  %v809_v16 = vld [vmem:[%s920_s27 + $0x60] ss:$16 sps:$4 sm:$0xff]  }
  0x16   : > { %v810_v17 = vld [vmem:[%s920_s27 + $0x68] ss:$16 sps:$4 sm:$0xff]   ;;  %v811_v18 = vld [vmem:[%s920_s27 + $0x84] ss:$16 sps:$4 sm:$0xff]   ;;  %v813_v19 = vld [vmem:[%s920_s27 + $0x8c] ss:$16 sps:$4 sm:$0xff]  }
  0x17   : > { %463 = vmatpush1.bf16.msra.mxu0 %v797_v8  ;;  %504 = vmatpush1.bf16.msra.mxu1 %v798_v9  ;;  %v815_v20 = vld [vmem:[%s920_s27 + $0x80] ss:$16 sps:$4 sm:$0xff]   ;;  %v816_v21 = vld [vmem:[%s920_s27 + $0x88] ss:$16 sps:$4 sm:$0xff]   ;;  %v817_v22 = vld [vmem:[%s920_s27 + $0xa4] ss:$16 sps:$4 sm:$0xff]  }
  0x18   : > { %464 = vmatprep.subr.bf16.mxu0 %v799_v10  ;;  %505 = vmatprep.subr.bf16.mxu1 %v801_v11  ;;  %v819_v23 = vld [vmem:[%s920_s27 + $0xac] ss:$16 sps:$4 sm:$0xff]   ;;  %v821_v24 = vld [vmem:[%s920_s27 + $0xa0] ss:$16 sps:$4 sm:$0xff]   ;;  %v822_v25 = vld [vmem:[%s920_s27 + $0xa8] ss:$16 sps:$4 sm:$0xff]  }
  0x19   : > { %v823_v26 = vld [vmem:[%s920_s27 + $0xc4] ss:$16 sps:$4 sm:$0xff]   ;;  %v825_v27 = vld [vmem:[%s920_s27 + $0xcc] ss:$16 sps:$4 sm:$0xff]   ;;  %v827_v28 = vld [vmem:[%s920_s27 + $0xc0] ss:$16 sps:$4 sm:$0xff]  }
  0x1a   : > { %v828_v29 = vld [vmem:[%s920_s27 + $0xc8] ss:$16 sps:$4 sm:$0xff]   ;;  %v829_v30 = vld [vmem:[%s920_s27 + $0xe4] ss:$16 sps:$4 sm:$0xff]   ;;  %v831_v31 = vld [vmem:[%s920_s27 + $0xec] ss:$16 sps:$4 sm:$0xff]  }
  0x1b   : > { %465 = vmatpush1.bf16.msra.mxu0 %v803_v12  ;;  %506 = vmatpush1.bf16.msra.mxu1 %v804_v13  ;;  %v833_v32 = vld [vmem:[%s920_s27 + $0xe0] ss:$16 sps:$4 sm:$0xff]   ;;  %v834_v33 = vld [vmem:[%s920_s27 + $0xe8] ss:$16 sps:$4 sm:$0xff]  }
  0x1c   : > { %466 = vmatprep.subr.bf16.mxu0 %v805_v14  ;;  %507 = vmatprep.subr.bf16.mxu1 %v807_v15  ;;  %v580_v9 = vld [vmem:[%s983_s3] sm:$0xff] }
  0x1d   : > { %v584_v12 = vld [vmem:[%s984_s4] sm:$0xff] }
  0x1f   : > { %467 = vmatpush1.bf16.msra.mxu0 %v809_v16  ;;  %508 = vmatpush1.bf16.msra.mxu1 %v810_v17 }
  0x20   : > { %468 = vmatprep.subr.bf16.mxu0 %v811_v18  ;;  %509 = vmatprep.subr.bf16.mxu1 %v813_v19 }
  0x23   : > { %469 = vmatpush1.bf16.msra.mxu0 %v815_v20  ;;  %510 = vmatpush1.bf16.msra.mxu1 %v816_v21 }
  0x24   : > { %470 = vmatprep.subr.bf16.mxu0 %v817_v22  ;;  %511 = vmatprep.subr.bf16.mxu1 %v819_v23 }
  0x27   : > { %471 = vmatpush1.bf16.msra.mxu0 %v821_v24  ;;  %512 = vmatpush1.bf16.msra.mxu1 %v822_v25 }
  0x28   : > { %472 = vmatprep.subr.bf16.mxu0 %v823_v26  ;;  %513 = vmatprep.subr.bf16.mxu1 %v825_v27 }
  0x2b   : > { %473 = vmatpush1.bf16.msra.mxu0 %v827_v28  ;;  %514 = vmatpush1.bf16.msra.mxu1 %v828_v29 }
  0x2c   : > { %474 = vmatprep.subr.bf16.mxu0 %v829_v30  ;;  %515 = vmatprep.subr.bf16.mxu1 %v831_v31 }
  0x2f   : > { %475 = vmatpush1.bf16.msra.mxu0 %v833_v32  ;;  %516 = vmatpush1.bf16.msra.mxu1 %v834_v33 }
  0x32   : > { %493 = vmatmul.mubr.bf16.vlgmr.msra.gmra.mrb[0].mxu0 %v261_v34  ;;  %534 = vmatmul.mubr.bf16.vlgmr.msra.gmra.mrb[0].mxu1 %v261_v34 }
  0x88   : > { %v298_v36 = vpop.permute.xlu0 %297 }
 0x105   : > { %v494_v37 = vpop.f32.mrb[0].mxu0  ;;  %v535_v38 = vpop.f32.mrb[0].mxu1 }
 0x106   : > { %v495_v39 = vadd.f32 %v494_v37, %v298_v36  ;;  %v496_v40 = vpop.f32.mrb[1].mxu0  ;;  %v537_v41 = vpop.f32.mrb[1].mxu1  ;;  %v536_v42 = vadd.f32 %v535_v38, %v298_v36 }
 0x107   : > { %v497_v43 = vadd.f32 %v496_v40, %v298_v36  ;;  %v498_v44 = vpop.f32.mrb[2].mxu0  ;;  %v539_v45 = vpop.f32.mrb[2].mxu1  ;;  %v538_v51 = vadd.f32 %v537_v41, %v298_v36 }
 0x108   : > { %v559_v46 = vmul.f32 %v495_v39, %v495_v39  ;;  %v499_v47 = vpop.f32.mrb[3].mxu0  ;;  %v540_v48 = vpop.f32.mrb[3].mxu1  ;;  %v561_v53 = vmul.f32 %v536_v42, %v536_v42 }
 0x109   : > { %v550_v49 = vadd.f32 %v497_v43, %v495_v39  ;;  %v560_v50 = vmul.f32 %v497_v43, %v497_v43  ;;  %v562_v56 = vmul.f32 %v538_v51, %v538_v51 }
 0x10b   : > { %v551_v52 = vadd.f32 %v550_v49, %v536_v42  ;;  %v563_v54 = vadd.f32 %v560_v50, %v559_v46 }
 0x10d   : > { %v552_v55 = vadd.f32 %v551_v52, %v538_v51  ;;  %v564_v57 = vadd.f32 %v563_v54, %v561_v53 }
 0x10f   : > { %553 = vadd.xlane.f32.xlu0 %v552_v55  ;;  %v565_v58 = vadd.f32 %v564_v57, %v562_v56 }
 0x111   : > { %566 = vadd.xlane.f32.xlu1 %v565_v58 }
 0x19c   : > { %v554_v60 = vpop.xlane.xlu0 %553 }
 0x19d   : > { %v555_v62 = vadd.f32 %v554_v60, %v549_v59 }
 0x19e   : > { %v567_v63 = vpop.xlane.xlu1 %566 }
 0x19f   : > { %557 = vst.msk [vmem:[#allocation3] sm:$0xff] %vm258_vm0, %v555_v62  ;;  %v568_v0 = vadd.f32 %v567_v63, %v558_v61 }
 0x1a1   : > { %569 = vst.msk [vmem:[#allocation4] sm:$0xff] %vm258_vm0, %v568_v0 }
 0x1a6   : > { %v573_v1 = vld [vmem:[#allocation3] sm:$0xff] }
 0x1a7   : > { %v574_v2 = vmul.f32 0.001953125, %v573_v1 }
 0x1a8   : > { %v575_v3 = vld [vmem:[#allocation4] sm:$0xff] }
 0x1a9   : > { %v576_v4 = vmul.f32 0.001953125, %v575_v3  ;;  %v577_v5 = vmul.f32 %v574_v2, %v574_v2 }
 0x1ab   : > { %v578_v6 = vsub.f32 %v576_v4, %v577_v5 }
 0x1ad   : > { %v579_v7 = vmax.f32 %v578_v6, 0.0 }
 0x1af   : > { %v581_v8 = vadd.f32 1e-05, %v579_v7 }
 0x1b1   : > { %835 = vrsqrt.f32 %v581_v8 }
 0x1bb   : > { %v836_v10 = vpop.eup %835 }
 0x1bc   : > { %v583_v11 = vmul.f32 %v836_v10, %v580_v9 }
 0x1be   : > { %593 = vperm.xlu1 %786, %v583_v11   ;;  %v585_v13 = vmul.f32 %v583_v11, %v574_v2 }
 0x1c0   : > { %v586_v14 = vsub.f32 %v584_v12, %v585_v13 }
 0x1c2   : > { %602 = vperm.xlu1 %786, %v586_v14  }
 0x23d   : > { %v594_v15 = vpop.permute.xlu1 %593 }
 0x23e   : > { %v596_v16 = vmul.f32 %v594_v15, %v495_v39  ;;  %v597_v17 = vmul.f32 %v594_v15, %v497_v43  ;;  %v598_v18 = vmul.f32 %v594_v15, %v536_v42  ;;  %v599_v19 = vmul.f32 %v594_v15, %v538_v51 }
 0x241   : > { %v603_v20 = vpop.permute.xlu1 %602 }
 0x242   : > { %v605_v21 = vadd.f32 %v603_v20, %v596_v16  ;;  %v606_v22 = vadd.f32 %v603_v20, %v597_v17  ;;  %v607_v23 = vadd.f32 %v603_v20, %v598_v18  ;;  %v608_v24 = vadd.f32 %v603_v20, %v599_v19 }
 0x244   : > { %vm609_vm1 = vcmp.ge.f32.partialorder %v605_v21, 0.0  ;;  %vm610_vm2 = vcmp.ge.f32.partialorder %v606_v22, 0.0  ;;  %vm611_vm3 = vcmp.ge.f32.partialorder %v607_v23, 0.0  ;;  %vm612_vm4 = vcmp.ge.f32.partialorder %v608_v24, 0.0 }
 0x245   : > { %v613_v25 = vmul.f32 0.01, %v605_v21  ;;  %v614_v26 = vmul.f32 0.01, %v606_v22  ;;  %v615_v27 = vmul.f32 0.01, %v607_v23 }
 0x246   : > { %v616_v28 = vmul.f32 0.01, %v608_v24 }
 0x247   : > { %v617_v29 = vsel %vm609_vm1, %v605_v21, %v613_v25  ;;  %v618_v30 = vsel %vm610_vm2, %v606_v22, %v614_v26  ;;  %v619_v31 = vsel %vm611_vm3, %v607_v23, %v615_v27 }
 0x248   : > { %v620_v32 = vsel %vm612_vm4, %v608_v24, %v616_v28  ;;  %v757_v33 = vpack.c.bf16 %v618_v30, %v617_v29 }
 0x249   : > { %v758_v34 = vpack.c.bf16 %v620_v32, %v619_v31 }
 0x24a   : > { %637 = vst [vmem:[%s252_s12] sm:$0xff] %v757_v33 }
 0x24b   : > { %638 = vst [vmem:[%s252_s12 + $0x8] sm:$0xff] %v758_v34 }
 0x24c PF: > { %s15_s20 = sadd.s32 1, %s859_s20   ;;  %s986_s18 = smov %s855_s19 }
 0x24d   : > { %p12_p5 = scmp.ge.s32.totalorder %s15_s20, 4   ;;  %s987_s19 = smov %s989_s21 }
 0x24f   :  { %14 = sbr.rel (!%p12_p5) target bundleno = 2 (0x2), region = 79 }

// kernel: double_conv_forward.3
= control target key start
LH: loop header
LB: loop body
LE: loop exit
PB: predicated region body
PF: predicated region fallthrough
CT: control target
= control target key end

     0   :  { %s1094_s18 = smov 0   ;;  %s1096_s19 = smov 0   ;;  %s1211_s0 = inlined_call_operand.vmem [shape: bf16[2,224,512], index: 0, kind: input, shape index: {}]   ;;  %s1212_s1 = inlined_call_operand.vmem [shape: bf16[8,224], index: 1, kind: input, shape index: {}]   ;;  %s1213_s2 = inlined_call_operand.vmem [shape: f32[8,1], index: 2, kind: input, shape index: {}]   ;;  %s1214_s3 = inlined_call_operand.vmem [shape: f32[8,1], index: 3, kind: input, shape index: {}]   ;;  %s1215_s4 = inlined_call_operand.vmem [shape: f32[8,1], index: 4, kind: input, shape index: {}]   ;;  %s1216_s5 = inlined_call_operand.vmem [shape: f32[2,8,512], index: 5, kind: output, shape index: {}]  }
   0x1   :  { %s1098_s20 = smov 0  }
   0x2 LB: > { %s27_s21 = sadd.s32 1, %s1056_s19  ;;  %p854_p0 = scmp.ge.s32.totalorder %s1060_s20, 1  ;;  %s1060_s20 = sphi %s1098_s20, %s15_s20   ;;  %s1056_s19 = sphi %s1096_s19, %s1218_s19   ;;  %s1052_s18 = sphi %s1094_s18, %s1217_s18  }
   0x3   : > { %p29_p1 = scmp.ge.s32.totalorder %s27_s21, 2  ;;  %p206_p2 = scmp.lt.s32.totalorder %s1060_s20, 3 }
   0x5   : > { %s1220_s21 = smov (%p29_p1, %s27_s21), 0  ;;  %p207_p3 = pnand %p854_p0, %p206_p2 }
   0x6   : > { %p239_p4 = scmp.lt.s32.totalorder (!%p207_p3), %s1052_s18, 1  ;;  %v1115_v0 = vld [vmem:[%s1212_s1] sm:$0xff] (!%p207_p3)  ;;  %vm610_vm0 = vcmask (!%p207_p3), 785408   ;;  %v1062_v3 = vmov (!%p207_p3), 0   ;;  %vm258_vm1 = vcmask (!%p207_p3), 7168   ;;  %v1063_v61 = vmov (!%p207_p3), 0.0  }
   0x7   : > { %210 = sbr.rel (%p207_p3) target bundleno = 611 (0x263), region = 40  ;;  %v318_v1 = vld [vmem:[%s1213_s2] sm:$0xff] (!%p207_p3)  ;;  %v859_v2 = vcombine.high (!%p207_p3), %v1115_v0, %v1115_v0  ;;  %948 = vset.pattern.permute.xlu0 (!%p207_p3), %v1062_v3  ;;  %949 = vset.pattern.permute.xlu1 (!%p207_p3), %v1062_v3  ;;  %v858_v60 = vcombine.low (!%p207_p3), %v1115_v0, %v1115_v0  ;;  %259 = vst.msk [vmem:[#allocation3] sm:$0xff] (!%p207_p3), %vm258_vm1, %v1063_v61  ;;  %260 = vst.msk [vmem:[#allocation4] sm:$0xff] (!%p207_p3), %vm258_vm1, %v1063_v61 }
   0x8   : > { %321 = vperm.xlu0 (!%p207_p3), %948, %v318_v1  }
   0x9   : > { %916 = vmatprep.mubr.msk.bf16.mxu0 (!%p207_p3), %vm610_vm0, %v859_v2  ;;  %917 = vmatprep.mubr.msk.bf16.mxu1 (!%p207_p3), %vm610_vm0, %v859_v2 }
   0xe   : > { %s1222_s18 = smov (!%p239_p4, %s1052_s18), 1 }
   0xf   : > { %s921_s26 = smul.u32 448, %s1222_s18  ;;  %s920_s9 = sshll.u32 %s1222_s18, 5 }
  0x10   : > { %s252_s12 = scalar_lea.vmem %s1216_s5, %s920_s9 }
  0x11   : > { %s1128_s29 = scalar_lea.vmem %s1211_s0, %s921_s26 }
  0x12   : > { %v950_v4 = vld [vmem:[%s1128_s29 + $0x4] ss:$16 sps:$4 sm:$0xff]   ;;  %v952_v5 = vld [vmem:[%s1128_s29 + $0xc] ss:$16 sps:$4 sm:$0xff]   ;;  %v954_v6 = vld [vmem:[%s1128_s29] ss:$16 sps:$4 sm:$0xff]  }
  0x13   : > { %614 = vmatprep.subr.bf16.mxu0 %v950_v4  ;;  %v955_v7 = vld [vmem:[%s1128_s29 + $0x8] ss:$16 sps:$4 sm:$0xff]   ;;  %655 = vmatprep.subr.bf16.mxu1 %v952_v5  ;;  %v956_v8 = vld [vmem:[%s1128_s29 + $0x24] ss:$16 sps:$4 sm:$0xff]   ;;  %v958_v9 = vld [vmem:[%s1128_s29 + $0x2c] ss:$16 sps:$4 sm:$0xff]  }
  0x14   : > { %615 = vmatpush1.bf16.msra.mxu0 %v954_v6  ;;  %656 = vmatpush1.bf16.msra.mxu1 %v955_v7  ;;  %v960_v10 = vld [vmem:[%s1128_s29 + $0x20] ss:$16 sps:$4 sm:$0xff]   ;;  %v961_v11 = vld [vmem:[%s1128_s29 + $0x28] ss:$16 sps:$4 sm:$0xff]   ;;  %v962_v12 = vld [vmem:[%s1128_s29 + $0x44] ss:$16 sps:$4 sm:$0xff]  }
  0x15   : > { %616 = vmatprep.subr.bf16.mxu0 %v956_v8  ;;  %657 = vmatprep.subr.bf16.mxu1 %v958_v9  ;;  %v964_v13 = vld [vmem:[%s1128_s29 + $0x4c] ss:$16 sps:$4 sm:$0xff]   ;;  %v966_v14 = vld [vmem:[%s1128_s29 + $0x40] ss:$16 sps:$4 sm:$0xff]   ;;  %v967_v15 = vld [vmem:[%s1128_s29 + $0x48] ss:$16 sps:$4 sm:$0xff]  }
  0x16   : > { %v968_v16 = vld [vmem:[%s1128_s29 + $0x64] ss:$16 sps:$4 sm:$0xff]   ;;  %v970_v17 = vld [vmem:[%s1128_s29 + $0x6c] ss:$16 sps:$4 sm:$0xff]   ;;  %v972_v18 = vld [vmem:[%s1128_s29 + $0x60] ss:$16 sps:$4 sm:$0xff]  }
  0x17   : > { %v973_v19 = vld [vmem:[%s1128_s29 + $0x68] ss:$16 sps:$4 sm:$0xff]   ;;  %v974_v20 = vld [vmem:[%s1128_s29 + $0x84] ss:$16 sps:$4 sm:$0xff]   ;;  %v976_v21 = vld [vmem:[%s1128_s29 + $0x8c] ss:$16 sps:$4 sm:$0xff]  }
  0x18   : > { %617 = vmatpush1.bf16.msra.mxu0 %v960_v10  ;;  %658 = vmatpush1.bf16.msra.mxu1 %v961_v11  ;;  %v978_v22 = vld [vmem:[%s1128_s29 + $0x80] ss:$16 sps:$4 sm:$0xff]   ;;  %v979_v23 = vld [vmem:[%s1128_s29 + $0x88] ss:$16 sps:$4 sm:$0xff]   ;;  %v980_v24 = vld [vmem:[%s1128_s29 + $0xa4] ss:$16 sps:$4 sm:$0xff]  }
  0x19   : > { %618 = vmatprep.subr.bf16.mxu0 %v962_v12  ;;  %659 = vmatprep.subr.bf16.mxu1 %v964_v13  ;;  %v982_v25 = vld [vmem:[%s1128_s29 + $0xac] ss:$16 sps:$4 sm:$0xff]   ;;  %v984_v26 = vld [vmem:[%s1128_s29 + $0xa0] ss:$16 sps:$4 sm:$0xff]   ;;  %v985_v27 = vld [vmem:[%s1128_s29 + $0xa8] ss:$16 sps:$4 sm:$0xff]  }
  0x1a   : > { %v986_v28 = vld [vmem:[%s1128_s29 + $0xc4] ss:$16 sps:$4 sm:$0xff]   ;;  %v988_v29 = vld [vmem:[%s1128_s29 + $0xcc] ss:$16 sps:$4 sm:$0xff]   ;;  %v990_v30 = vld [vmem:[%s1128_s29 + $0xc0] ss:$16 sps:$4 sm:$0xff]  }
  0x1b   : > { %v991_v31 = vld [vmem:[%s1128_s29 + $0xc8] ss:$16 sps:$4 sm:$0xff]   ;;  %v992_v32 = vld [vmem:[%s1128_s29 + $0xe4] ss:$16 sps:$4 sm:$0xff]   ;;  %v994_v33 = vld [vmem:[%s1128_s29 + $0xec] ss:$16 sps:$4 sm:$0xff]  }
  0x1c   : > { %619 = vmatpush1.bf16.msra.mxu0 %v966_v14  ;;  %660 = vmatpush1.bf16.msra.mxu1 %v967_v15  ;;  %v996_v34 = vld [vmem:[%s1128_s29 + $0xe0] ss:$16 sps:$4 sm:$0xff]   ;;  %v997_v35 = vld [vmem:[%s1128_s29 + $0xe8] ss:$16 sps:$4 sm:$0xff]   ;;  %v998_v36 = vld [vmem:[%s1128_s29 + $0x104] ss:$16 sps:$4 sm:$0xff]  }
  0x1d   : > { %620 = vmatprep.subr.bf16.mxu0 %v968_v16  ;;  %661 = vmatprep.subr.bf16.mxu1 %v970_v17  ;;  %v1000_v37 = vld [vmem:[%s1128_s29 + $0x10c] ss:$16 sps:$4 sm:$0xff]   ;;  %v1002_v38 = vld [vmem:[%s1128_s29 + $0x100] ss:$16 sps:$4 sm:$0xff]   ;;  %v1003_v39 = vld [vmem:[%s1128_s29 + $0x108] ss:$16 sps:$4 sm:$0xff]  }
  0x1e   : > { %v1004_v40 = vld [vmem:[%s1128_s29 + $0x124] ss:$16 sps:$4 sm:$0xff]   ;;  %v1006_v41 = vld [vmem:[%s1128_s29 + $0x12c] ss:$16 sps:$4 sm:$0xff]   ;;  %v1008_v42 = vld [vmem:[%s1128_s29 + $0x120] ss:$16 sps:$4 sm:$0xff]  }
  0x1f   : > { %v1009_v43 = vld [vmem:[%s1128_s29 + $0x128] ss:$16 sps:$4 sm:$0xff]   ;;  %v1010_v44 = vld [vmem:[%s1128_s29 + $0x144] ss:$16 sps:$4 sm:$0xff]   ;;  %v1012_v45 = vld [vmem:[%s1128_s29 + $0x14c] ss:$16 sps:$4 sm:$0xff]  }
  0x20   : > { %621 = vmatpush1.bf16.msra.mxu0 %v972_v18  ;;  %662 = vmatpush1.bf16.msra.mxu1 %v973_v19  ;;  %v1014_v46 = vld [vmem:[%s1128_s29 + $0x140] ss:$16 sps:$4 sm:$0xff]   ;;  %v1015_v47 = vld [vmem:[%s1128_s29 + $0x148] ss:$16 sps:$4 sm:$0xff]   ;;  %v1016_v48 = vld [vmem:[%s1128_s29 + $0x164] ss:$16 sps:$4 sm:$0xff]  }
  0x21   : > { %622 = vmatprep.subr.bf16.mxu0 %v974_v20  ;;  %663 = vmatprep.subr.bf16.mxu1 %v976_v21  ;;  %v1018_v49 = vld [vmem:[%s1128_s29 + $0x16c] ss:$16 sps:$4 sm:$0xff]   ;;  %v1020_v50 = vld [vmem:[%s1128_s29 + $0x160] ss:$16 sps:$4 sm:$0xff]   ;;  %v1021_v51 = vld [vmem:[%s1128_s29 + $0x168] ss:$16 sps:$4 sm:$0xff]  }
  0x22   : > { %v1022_v52 = vld [vmem:[%s1128_s29 + $0x184] ss:$16 sps:$4 sm:$0xff]   ;;  %v1024_v53 = vld [vmem:[%s1128_s29 + $0x18c] ss:$16 sps:$4 sm:$0xff]   ;;  %v1026_v54 = vld [vmem:[%s1128_s29 + $0x180] ss:$16 sps:$4 sm:$0xff]  }
  0x23   : > { %v1027_v55 = vld [vmem:[%s1128_s29 + $0x188] ss:$16 sps:$4 sm:$0xff]   ;;  %v1028_v56 = vld [vmem:[%s1128_s29 + $0x1a4] ss:$16 sps:$4 sm:$0xff]   ;;  %v1030_v57 = vld [vmem:[%s1128_s29 + $0x1ac] ss:$16 sps:$4 sm:$0xff]  }
  0x24   : > { %623 = vmatpush1.bf16.msra.mxu0 %v978_v22  ;;  %664 = vmatpush1.bf16.msra.mxu1 %v979_v23  ;;  %v1032_v58 = vld [vmem:[%s1128_s29 + $0x1a0] ss:$16 sps:$4 sm:$0xff]   ;;  %v1033_v59 = vld [vmem:[%s1128_s29 + $0x1a8] ss:$16 sps:$4 sm:$0xff]  }
  0x25   : > { %624 = vmatprep.subr.bf16.mxu0 %v980_v24  ;;  %665 = vmatprep.subr.bf16.mxu1 %v982_v25  ;;  %v703_v21 = vld [vmem:[#allocation3] sm:$0xff]  ;;  %v712_v23 = vld [vmem:[#allocation4] sm:$0xff] }
  0x28   : > { %625 = vmatpush1.bf16.msra.mxu0 %v984_v26  ;;  %666 = vmatpush1.bf16.msra.mxu1 %v985_v27 }
  0x29   : > { %626 = vmatprep.subr.bf16.mxu0 %v986_v28  ;;  %667 = vmatprep.subr.bf16.mxu1 %v988_v29 }
  0x2c   : > { %627 = vmatpush1.bf16.msra.mxu0 %v990_v30  ;;  %668 = vmatpush1.bf16.msra.mxu1 %v991_v31 }
  0x2d   : > { %628 = vmatprep.subr.bf16.mxu0 %v992_v32  ;;  %669 = vmatprep.subr.bf16.mxu1 %v994_v33 }
  0x30   : > { %629 = vmatpush1.bf16.msra.mxu0 %v996_v34  ;;  %670 = vmatpush1.bf16.msra.mxu1 %v997_v35  ;;  %v734_v35 = vld [vmem:[%s1214_s3] sm:$0xff] }
  0x31   : > { %630 = vmatprep.subr.bf16.mxu0 %v998_v36  ;;  %671 = vmatprep.subr.bf16.mxu1 %v1000_v37 }
  0x34   : > { %631 = vmatpush1.bf16.msra.mxu0 %v1002_v38  ;;  %672 = vmatpush1.bf16.msra.mxu1 %v1003_v39  ;;  %v738_v38 = vld [vmem:[%s1215_s4] sm:$0xff] }
  0x35   : > { %632 = vmatprep.subr.bf16.mxu0 %v1004_v40  ;;  %673 = vmatprep.subr.bf16.mxu1 %v1006_v41 }
  0x38   : > { %633 = vmatpush1.bf16.msra.mxu0 %v1008_v42  ;;  %674 = vmatpush1.bf16.msra.mxu1 %v1009_v43 }
  0x39   : > { %634 = vmatprep.subr.bf16.mxu0 %v1010_v44  ;;  %675 = vmatprep.subr.bf16.mxu1 %v1012_v45 }
  0x3c   : > { %635 = vmatpush1.bf16.msra.mxu0 %v1014_v46  ;;  %676 = vmatpush1.bf16.msra.mxu1 %v1015_v47 }
  0x3d   : > { %636 = vmatprep.subr.bf16.mxu0 %v1016_v48  ;;  %677 = vmatprep.subr.bf16.mxu1 %v1018_v49 }
  0x40   : > { %637 = vmatpush1.bf16.msra.mxu0 %v1020_v50  ;;  %678 = vmatpush1.bf16.msra.mxu1 %v1021_v51 }
  0x41   : > { %638 = vmatprep.subr.bf16.mxu0 %v1022_v52  ;;  %679 = vmatprep.subr.bf16.mxu1 %v1024_v53 }
  0x44   : > { %639 = vmatpush1.bf16.msra.mxu0 %v1026_v54  ;;  %680 = vmatpush1.bf16.msra.mxu1 %v1027_v55 }
  0x45   : > { %640 = vmatprep.subr.bf16.mxu0 %v1028_v56  ;;  %681 = vmatprep.subr.bf16.mxu1 %v1030_v57 }
  0x48   : > { %641 = vmatpush1.bf16.msra.mxu0 %v1032_v58  ;;  %682 = vmatpush1.bf16.msra.mxu1 %v1033_v59 }
  0x4b   : > { %647 = vmatmul.mubr.bf16.vlgmr.msra.gmra.mrb[0].mxu0 %v858_v60  ;;  %688 = vmatmul.mubr.bf16.vlgmr.msra.gmra.mrb[0].mxu1 %v858_v60 }
  0x87   : > { %v322_v62 = vpop.permute.xlu0 %321 }
 0x11e   : > { %v648_v63 = vpop.f32.mrb[0].mxu0  ;;  %v689_v1 = vpop.f32.mrb[0].mxu1 }
 0x11f   : > { %v649_v2 = vadd.f32 %v648_v63, %v322_v62  ;;  %v650_v3 = vpop.f32.mrb[1].mxu0  ;;  %v691_v4 = vpop.f32.mrb[1].mxu1  ;;  %v690_v5 = vadd.f32 %v689_v1, %v322_v62 }
 0x120   : > { %v651_v6 = vadd.f32 %v650_v3, %v322_v62  ;;  %v652_v7 = vpop.f32.mrb[2].mxu0  ;;  %v693_v0 = vpop.f32.mrb[2].mxu1  ;;  %v692_v13 = vadd.f32 %v691_v4, %v322_v62 }
 0x121   : > { %v713_v8 = vmul.f32 %v649_v2, %v649_v2  ;;  %v653_v9 = vpop.f32.mrb[3].mxu0  ;;  %v694_v10 = vpop.f32.mrb[3].mxu1  ;;  %v715_v15 = vmul.f32 %v690_v5, %v690_v5 }
 0x122   : > { %v704_v11 = vadd.f32 %v651_v6, %v649_v2  ;;  %v714_v12 = vmul.f32 %v651_v6, %v651_v6  ;;  %v716_v18 = vmul.f32 %v692_v13, %v692_v13 }
 0x124   : > { %v705_v14 = vadd.f32 %v704_v11, %v690_v5  ;;  %v717_v16 = vadd.f32 %v714_v12, %v713_v8 }
 0x126   : > { %v706_v17 = vadd.f32 %v705_v14, %v692_v13  ;;  %v718_v19 = vadd.f32 %v717_v16, %v715_v15 }
 0x128   : > { %707 = vadd.xlane.f32.xlu0 %v706_v17  ;;  %v719_v20 = vadd.f32 %v718_v19, %v716_v18 }
 0x12a   : > { %720 = vadd.xlane.f32.xlu1 %v719_v20 }
 0x1b5   : > { %v708_v22 = vpop.xlane.xlu0 %707 }
 0x1b6   : > { %v709_v24 = vadd.f32 %v708_v22, %v703_v21 }
 0x1b7   : > { %v721_v25 = vpop.xlane.xlu1 %720 }
 0x1b8   : > { %711 = vst.msk [vmem:[#allocation3] sm:$0xff] %vm258_vm1, %v709_v24  ;;  %v722_v26 = vadd.f32 %v721_v25, %v712_v23 }
 0x1ba   : > { %723 = vst.msk [vmem:[#allocation4] sm:$0xff] %vm258_vm1, %v722_v26 }
 0x1bf   : > { %v727_v27 = vld [vmem:[#allocation3] sm:$0xff] }
 0x1c0   : > { %v728_v28 = vmul.f32 0.001953125, %v727_v27 }
 0x1c1   : > { %v729_v29 = vld [vmem:[#allocation4] sm:$0xff] }
 0x1c2   : > { %v730_v30 = vmul.f32 0.001953125, %v729_v29  ;;  %v731_v31 = vmul.f32 %v728_v28, %v728_v28 }
 0x1c4   : > { %v732_v32 = vsub.f32 %v730_v30, %v731_v31 }
 0x1c6   : > { %v733_v33 = vmax.f32 %v732_v32, 0.0 }
 0x1c8   : > { %v735_v34 = vadd.f32 1e-05, %v733_v33 }
 0x1ca   : > { %1036 = vrsqrt.f32 %v735_v34 }
 0x1d4   : > { %v1037_v36 = vpop.eup %1036 }
 0x1d5   : > { %v737_v37 = vmul.f32 %v1037_v36, %v734_v35 }
 0x1d7   : > { %747 = vperm.xlu1 %949, %v737_v37   ;;  %v739_v39 = vmul.f32 %v737_v37, %v728_v28 }
 0x1d9   : > { %v740_v40 = vsub.f32 %v738_v38, %v739_v39 }
 0x1db   : > { %756 = vperm.xlu1 %949, %v740_v40  }
 0x256   : > { %v748_v41 = vpop.permute.xlu1 %747 }
 0x257   : > { %v750_v42 = vmul.f32 %v748_v41, %v649_v2  ;;  %v751_v43 = vmul.f32 %v748_v41, %v651_v6  ;;  %v752_v44 = vmul.f32 %v748_v41, %v690_v5  ;;  %v753_v45 = vmul.f32 %v748_v41, %v692_v13 }
 0x25a   : > { %v757_v46 = vpop.permute.xlu1 %756 }
 0x25b   : > { %v759_v47 = vadd.f32 %v757_v46, %v750_v42  ;;  %v760_v48 = vadd.f32 %v757_v46, %v751_v43  ;;  %v761_v49 = vadd.f32 %v757_v46, %v752_v44  ;;  %v762_v50 = vadd.f32 %v757_v46, %v753_v45 }
 0x25d   : > { %vm763_vm2 = vcmp.ge.f32.partialorder %v759_v47, 0.0  ;;  %vm764_vm3 = vcmp.ge.f32.partialorder %v760_v48, 0.0  ;;  %vm765_vm4 = vcmp.ge.f32.partialorder %v761_v49, 0.0  ;;  %vm766_vm5 = vcmp.ge.f32.partialorder %v762_v50, 0.0 }
 0x25e   : > { %v767_v51 = vmul.f32 0.01, %v759_v47  ;;  %v768_v52 = vmul.f32 0.01, %v760_v48  ;;  %v769_v53 = vmul.f32 0.01, %v761_v49 }
 0x25f   : > { %v770_v54 = vmul.f32 0.01, %v762_v50 }
 0x260   : > { %v771_v55 = vsel %vm763_vm2, %v759_v47, %v767_v51  ;;  %v772_v56 = vsel %vm764_vm3, %v760_v48, %v768_v52  ;;  %v773_v57 = vsel %vm765_vm4, %v761_v49, %v769_v53 }
 0x261   : > { %v774_v58 = vsel %vm766_vm5, %v762_v50, %v770_v54  ;;  %775 = vst [vmem:[%s252_s12] sm:$0xff] %v771_v55  ;;  %776 = vst [vmem:[%s252_s12 + $0x8] sm:$0xff] %v772_v56 }
 0x262   : > { %777 = vst [vmem:[%s252_s12 + $0x10] sm:$0xff] %v773_v57  ;;  %778 = vst [vmem:[%s252_s12 + $0x18] sm:$0xff] %v774_v58 }
 0x263 PF: > { %s15_s20 = sadd.s32 1, %s1060_s20   ;;  %s1217_s18 = smov %s1056_s19 }
 0x264   : > { %p12_p5 = scmp.ge.s32.totalorder %s15_s20, 4   ;;  %s1218_s19 = smov %s1220_s21 }
 0x266   :  { %14 = sbr.rel (!%p12_p5) target bundleno = 2 (0x2), region = 79 }

</bundles_post_ra>
